<compile_context>
chip_gen: v6e
topology: v6e:2x2x1
jax: 0.10.0
libtpu: 0.0.40
codegen_flags: <defaults>
</compile_context>

<pallas_src>
import jax
import jax.numpy as jnp
import numpy as np
from jax.experimental import pallas as pl
from jax.experimental.pallas import tpu as pltpu

H = 32        # hidden_size
V = 64        # output_size (vocab)
S = 8         # encoder sequence length (<= MAX_LENGTH)
L = 2         # n_layers of the GRU
VPAD = 128    # lane-padded vocab width for lane-dense output stores
SPAD = 128    # lane-padded seq width for lane-dense attention stores
NEG_BIG = -1e30

# Row offsets inside the packed GRU weight slab (width 6H = 192).
R_W0 = 0                 # layer-0 block-diag weight, rows [0, 3H)
R_B0 = R_W0 + 3 * H      # layer-0 bias row (rows padded to 8)
R_W1 = R_B0 + 8          # layer-1 block-diag weight, rows [R_W1, R_W1 + 2H)
R_B1 = R_W1 + 2 * H      # layer-1 bias row
W_GRU_ROWS = R_B1 + 8    # 176


def attn_decoder_kernel(
    widx_ref,                  # SMEM scalar prefetch: (T,) int32 word indices (used in index_maps)
    emb_ref,                   # (1, 1, H)   embedded word row (gathered by BlockSpec DMA)
    wg_ref,                    # (176, 192)  packed block-diagonal GRU weights + biases
    wo_ref,                    # (72, 128)   packed out-Linear weight (lane-padded) + bias (pad = -1e30)
    encp_ref,                  # (40, 128)   rows 0:H = W_attn@enc^T + b_attn (cols>=S zero),
                               #             row H = additive mask (0 / -1e30)
    encv_ref,                  # (128, 32)   encoder_outputs, zero-padded to SPAD rows
    ctx0_ref,                  # (1, H)      initial last_context
    hid0_ref,                  # (L, H)      initial last_hidden
    out_ref,                   # (1, 1, VPAD) per-step log_softmax output (lane-padded)
    ctxo_ref,                  # (1, 1, H)    per-step context
    hido_ref,                  # (1, L, H)    per-step hidden
    attnw_ref,                 # (1, 1, SPAD) per-step attention weights (lane-padded)
    ctx_sc,                    # VMEM (1, H)  carried context
    h_sc,                      # VMEM (L, H)  carried hidden state
):
    t = pl.program_id(0)

    @pl.when(t == 0)
    def _init():
        ctx_sc[...] = ctx0_ref[...]
        h_sc[...] = hid0_ref[...]

    emb = emb_ref[...].reshape(1, H)          # (1, H) embedded word (DMA-gathered row)
    ctx_prev = ctx_sc[...]                    # (1, H)
    h0_prev = h_sc[0:1, :]
    h1_prev = h_sc[1:2, :]

    def gru_layer(x_cat, h_prev, w_row, w_len, b_row):
        # One block-diagonal matmul produces [gi | gh] (1, 6H); PyTorch gate order r,z,n.
        g = (jnp.dot(x_cat, wg_ref[w_row:w_row + w_len, :],
                     preferred_element_type=jnp.float32)
             + wg_ref[b_row:b_row + 1, :])
        i_r, i_z, i_n = g[:, 0:H], g[:, H:2 * H], g[:, 2 * H:3 * H]
        h_r, h_z, h_n = g[:, 3 * H:4 * H], g[:, 4 * H:5 * H], g[:, 5 * H:6 * H]
        r = jax.nn.sigmoid(i_r + h_r)
        z = jax.nn.sigmoid(i_z + h_z)
        n = jnp.tanh(i_n + r * h_n)
        return (1.0 - z) * n + z * h_prev

    # ---- GRU layer 0: input = cat(word_embedded, last_context); h folded into same dot.
    x0 = jnp.concatenate([emb, ctx_prev, h0_prev], axis=1)          # (1, 3H)
    h0_new = gru_layer(x0, h0_prev, R_W0, 3 * H, R_B0)

    # ---- GRU layer 1.
    # TODO(synk): nn.GRU inter-layer dropout (p=dropout_p) is training-only; eval forward here.
    x1 = jnp.concatenate([h0_new, h1_prev], axis=1)                 # (1, 2H)
    h1_new = gru_layer(x1, h1_prev, R_W1, 2 * H, R_B1)
    rnn_out = h1_new                                                # (1, H)

    # ---- Attention 'general' (projection hoisted to the wrapper, loop-invariant).
    energies = (jnp.dot(rnn_out, encp_ref[0:H, :], preferred_element_type=jnp.float32)
                + encp_ref[H:H + 1, :])                             # (1, SPAD); pad lanes = -1e30
    m = jnp.max(energies, axis=1, keepdims=True)
    e = jnp.exp(energies - m)                                       # pad lanes -> 0
    attn_w = e * pl.reciprocal(jnp.sum(e, axis=1, keepdims=True), approx=True)

    # ---- context = attn_weights @ encoder_outputs (zero-padded rows contribute 0).
    context = jnp.dot(attn_w, encv_ref[...], preferred_element_type=jnp.float32)   # (1, H)

    # ---- output = log_softmax(out(cat(rnn_out, context))); V lane-padded, pad bias = -1e30.
    xo = jnp.concatenate([rnn_out, context], axis=1)                # (1, 2H)
    logits = (jnp.dot(xo, wo_ref[0:2 * H, :], preferred_element_type=jnp.float32)
              + wo_ref[2 * H:2 * H + 1, :])                         # (1, VPAD)
    shifted = logits - jnp.max(logits, axis=1, keepdims=True)
    log_probs = shifted - jnp.log(jnp.sum(jnp.exp(shifted), axis=1, keepdims=True))

    # ---- carry state in VMEM for the next decode step.
    ctx_sc[...] = context
    h_sc[0:1, :] = h0_new
    h_sc[1:2, :] = h1_new

    # ---- per-step outputs (lane-dense for the 128-wide slabs).
    out_ref[...] = log_probs.reshape(1, 1, VPAD)
    attnw_ref[...] = attn_w.reshape(1, 1, SPAD)
    ctxo_ref[...] = context.reshape(1, 1, H)
    hido_ref[...] = h_sc[...].reshape(1, L, H)


def make_params(key):
    ks = jax.random.split(key, 13)
    w = lambda k, shape, s=0.1: (s * jax.random.normal(k, shape)).astype(jnp.float32)
    return dict(
        emb=w(ks[0], (V, H), 0.5),
        # GRU layer 0 (PyTorch layout: weight_ih_l0 (3H, 2H), weight_hh_l0 (3H, H))
        wih0=w(ks[1], (3 * H, 2 * H)), whh0=w(ks[2], (3 * H, H)),
        bih0=w(ks[3], (3 * H,)), bhh0=w(ks[4], (3 * H,)),
        # GRU layer 1 (weight_ih_l1 (3H, H))
        wih1=w(ks[5], (3 * H, H)), whh1=w(ks[6], (3 * H, H)),
        bih1=w(ks[7], (3 * H,)), bhh1=w(ks[8], (3 * H,)),
        # Attn('general') Linear(H, H)
        wattn=w(ks[9], (H, H)), battn=w(ks[10], (H,)),
        # out Linear(2H, V)
        wout=w(ks[11], (V, 2 * H)), bout=w(ks[12], (V,)),
    )


def attn_decoder_forward(params, word_idx, last_context, last_hidden, encoder_outputs):
    """Teacher-forced T-step decode.

    word_idx (T,) int32; last_context (1,H); last_hidden (L,1,H); encoder_outputs (S,1,H).
    Returns per-step (output (T,V), context (T,H), hidden (T,L,1,H), attn (T,1,1,S)),
    exactly matching T sequential calls of the PyTorch forward.
    """
    T = word_idx.shape[0]
    F32 = jnp.float32
    enc = encoder_outputs.reshape(S, H).astype(F32)

    def pad_rows(x, rows):
        return jnp.concatenate([x, jnp.zeros((rows - x.shape[0], x.shape[1]), F32)], axis=0)

    def gru_block(wih, whh, bih, bhh):
        wih_t, whh_t = wih.T, whh.T                      # (Din, 3H), (H, 3H)
        din = wih_t.shape[0]
        top = jnp.concatenate([wih_t, jnp.zeros((din, 3 * H), F32)], axis=1)
        bot = jnp.concatenate([jnp.zeros((H, 3 * H), F32), whh_t], axis=1)
        blk = jnp.concatenate([top, bot], axis=0)        # (Din+H, 6H) block-diagonal
        bias = jnp.concatenate([bih, bhh]).reshape(1, 6 * H)
        return blk, pad_rows(bias, 8)

    blk0, b0 = gru_block(params["wih0"], params["whh0"], params["bih0"], params["bhh0"])
    blk1, b1 = gru_block(params["wih1"], params["whh1"], params["bih1"], params["bhh1"])
    w_gru = jnp.concatenate([blk0, b0, blk1, b1], axis=0)                # (176, 192)
    assert w_gru.shape == (W_GRU_ROWS, 6 * H)

    wout_pad = jnp.concatenate([params["wout"].T,
                                jnp.zeros((2 * H, VPAD - V), F32)], axis=1)          # (2H, VPAD)
    bout_pad = jnp.concatenate([params["bout"],
                                jnp.full((VPAD - V,), NEG_BIG, F32)]).reshape(1, VPAD)
    w_out = jnp.concatenate([wout_pad, pad_rows(bout_pad, 8)], axis=0)   # (72, 128)

    # Hoisted 'general' attention projection: enc_proj_T = (enc @ W_attn^T + b_attn)^T.
    enc_proj_t = (enc @ params["wattn"].T + params["battn"]).T           # (H, S)
    mask_row = jnp.concatenate([jnp.zeros((1, S), F32),
                                jnp.full((1, SPAD - S), NEG_BIG, F32)], axis=1)
    encp = jnp.concatenate([
        jnp.concatenate([enc_proj_t, jnp.zeros((H, SPAD - S), F32)], axis=1),
        pad_rows(mask_row, 8),
    ], axis=0)                                                           # (40, SPAD)
    enc_pad = jnp.concatenate([enc, jnp.zeros((SPAD - S, H), F32)], axis=0)  # (SPAD, H)

    emb3 = params["emb"].reshape(V, 1, H)
    ctx0 = last_context.reshape(1, H).astype(F32)
    hid0 = last_hidden.reshape(L, H).astype(F32)

    grid_spec = pltpu.PrefetchScalarGridSpec(
        num_scalar_prefetch=1,
        grid=(T,),
        in_specs=[
            # embedding row gather: DMA only row word_idx[t] each step
            pl.BlockSpec((1, 1, H), lambda t, widx: (widx[t], 0, 0)),
            # weight slabs / encoder tensors: constant index -> fetched once, VMEM-resident
            pl.BlockSpec(w_gru.shape, lambda t, widx: (0, 0)),
            pl.BlockSpec(w_out.shape, lambda t, widx: (0, 0)),
            pl.BlockSpec(encp.shape, lambda t, widx: (0, 0)),
            pl.BlockSpec(enc_pad.shape, lambda t, widx: (0, 0)),
            pl.BlockSpec((1, H), lambda t, widx: (0, 0)),
            pl.BlockSpec((L, H), lambda t, widx: (0, 0)),
        ],
        out_specs=[
            pl.BlockSpec((1, 1, VPAD), lambda t, widx: (t, 0, 0)),
            pl.BlockSpec((1, 1, H), lambda t, widx: (t, 0, 0)),
            pl.BlockSpec((1, L, H), lambda t, widx: (t, 0, 0)),
            pl.BlockSpec((1, 1, SPAD), lambda t, widx: (t, 0, 0)),
        ],
        scratch_shapes=[pltpu.VMEM((1, H), jnp.float32),
                        pltpu.VMEM((L, H), jnp.float32)],
    )
    out_shapes = (
        jax.ShapeDtypeStruct((T, 1, VPAD), jnp.float32),
        jax.ShapeDtypeStruct((T, 1, H), jnp.float32),
        jax.ShapeDtypeStruct((T, L, H), jnp.float32),
        jax.ShapeDtypeStruct((T, 1, SPAD), jnp.float32),
    )
    out_pad, ctx_steps, hid_steps, attn_pad = pl.pallas_call(
        attn_decoder_kernel,
        grid_spec=grid_spec,
        out_shape=out_shapes,
        compiler_params=pltpu.CompilerParams(dimension_semantics=("arbitrary",)),
    )(word_idx.astype(jnp.int32), emb3, w_gru, w_out, encp, enc_pad, ctx0, hid0)

    output = out_pad[:, 0, :V]                       # strip lane padding
    context = ctx_steps[:, 0, :]
    hidden = hid_steps.reshape(T, L, 1, H)
    attn_w = attn_pad[:, 0, :S].reshape(T, 1, 1, S)
    return output, context, hidden, attn_w


def reference_step(params, widx, last_context, last_hidden, enc):
    emb = params["emb"][widx][None, :]
    x0 = jnp.concatenate([emb, last_context], axis=1)

    def gru_cell(x, h, wih, whh, bih, bhh):
        gi = x @ wih.T + bih
        gh = h @ whh.T + bhh
        i_r, i_z, i_n = jnp.split(gi, 3, axis=1)
        h_r, h_z, h_n = jnp.split(gh, 3, axis=1)
        r = jax.nn.sigmoid(i_r + h_r)
        z = jax.nn.sigmoid(i_z + h_z)
        n = jnp.tanh(i_n + r * h_n)
        return (1.0 - z) * n + z * h

    h0 = gru_cell(x0, last_hidden[0:1], params["wih0"], params["whh0"],
                  params["bih0"], params["bhh0"])
    h1 = gru_cell(h0, last_hidden[1:2], params["wih1"], params["whh1"],
                  params["bih1"], params["bhh1"])
    rnn_out = h1
    proj = enc @ params["wattn"].T + params["battn"]
    energies = rnn_out @ proj.T
    attn_w = jax.nn.softmax(energies, axis=1)
    context = attn_w @ enc
    logits = jnp.concatenate([rnn_out, context], axis=1) @ params["wout"].T + params["bout"]
    output = jax.nn.log_softmax(logits, axis=1)
    hidden = jnp.concatenate([h0, h1], axis=0)
    return output, context, hidden, attn_w


def reference_forward(params, word_idx, last_context, last_hidden, encoder_outputs):
    T = word_idx.shape[0]
    enc = encoder_outputs.reshape(S, H)
    ctx = last_context
    hid = last_hidden.reshape(L, H)
    outs, ctxs, hids, attns = [], [], [], []
    for t in range(T):
        o, ctx, hid, a = reference_step(params, word_idx[t], ctx, hid, enc)
        outs.append(o); ctxs.append(ctx); hids.append(hid); attns.append(a)
    return (jnp.concatenate(outs, axis=0),
            jnp.concatenate(ctxs, axis=0),
            jnp.stack(hids, axis=0).reshape(T, L, 1, H),
            jnp.stack(attns, axis=0).reshape(T, 1, 1, S))


if __name__ == "__main__":
    key = jax.random.PRNGKey(0)
    kp, k1, k2, k3 = jax.random.split(key, 4)
    params = make_params(kp)

    word_idx = jnp.array([1, 2, 3], dtype=jnp.int32)     # T=3 teacher-forced decode steps
    last_context = jax.random.normal(k1, (1, H), jnp.float32)
    last_hidden = jax.random.normal(k2, (L, 1, H), jnp.float32)
    encoder_outputs = jax.random.normal(k3, (S, 1, H), jnp.float32)

    out, ctx, hid, attnw = attn_decoder_forward(
        params, word_idx, last_context, last_hidden, encoder_outputs)
    jax.block_until_ready((out, ctx, hid, attnw))

    ro, rc, rh, ra = reference_forward(
        params, word_idx, last_context, last_hidden, encoder_outputs)
    np.testing.assert_allclose(np.asarray(out), np.asarray(ro), rtol=2e-2, atol=2e-2)
    np.testing.assert_allclose(np.asarray(ctx), np.asarray(rc), rtol=2e-2, atol=2e-2)
    np.testing.assert_allclose(np.asarray(hid), np.asarray(rh), rtol=2e-2, atol=2e-2)
    np.testing.assert_allclose(np.asarray(attnw), np.asarray(ra), rtol=2e-2, atol=2e-2)
    print("KERNEL_OK")
</pallas_src>

<mosaic_0001>
module attributes {stable_mosaic.version = 11 : i64} {
  func.func @attn_decoder_kernel(%arg0: i32, %arg1: memref<3xi32, #tpu.memory_space<smem>>, %arg2: memref<1x1x32xf32, #tpu.memory_space<vmem>>, %arg3: memref<176x192xf32, #tpu.memory_space<vmem>>, %arg4: memref<72x128xf32, #tpu.memory_space<vmem>>, %arg5: memref<40x128xf32, #tpu.memory_space<vmem>>, %arg6: memref<128x32xf32, #tpu.memory_space<vmem>>, %arg7: memref<1x32xf32, #tpu.memory_space<vmem>>, %arg8: memref<2x32xf32, #tpu.memory_space<vmem>>, %arg9: memref<1x1x128xf32, #tpu.memory_space<vmem>>, %arg10: memref<1x1x32xf32, #tpu.memory_space<vmem>>, %arg11: memref<1x2x32xf32, #tpu.memory_space<vmem>>, %arg12: memref<1x1x128xf32, #tpu.memory_space<vmem>>, %arg13: memref<1x32xf32, #tpu.memory_space<vmem>>, %arg14: memref<2x32xf32, #tpu.memory_space<vmem>>) attributes {dimension_semantics = [#tpu.dimension_semantics<arbitrary>], iteration_bounds = array<i64: 3>, scalar_prefetch = 1 : i64, scratch_operands = 2 : i64, tpu.core_type = #tpu.core_type<tc>, window_params = [{transform_indices = @transform_0, window_bounds = array<i64: 1, 1, 32>}, {pipeline_mode = #tpu.pipeline_mode<synchronous>, transform_indices = @transform_1, window_bounds = array<i64: 176, 192>}, {pipeline_mode = #tpu.pipeline_mode<synchronous>, transform_indices = @transform_2, window_bounds = array<i64: 72, 128>}, {pipeline_mode = #tpu.pipeline_mode<synchronous>, transform_indices = @transform_3, window_bounds = array<i64: 40, 128>}, {pipeline_mode = #tpu.pipeline_mode<synchronous>, transform_indices = @transform_4, window_bounds = array<i64: 128, 32>}, {pipeline_mode = #tpu.pipeline_mode<synchronous>, transform_indices = @transform_5, window_bounds = array<i64: 1, 32>}, {pipeline_mode = #tpu.pipeline_mode<synchronous>, transform_indices = @transform_6, window_bounds = array<i64: 2, 32>}, {transform_indices = @transform_7, window_bounds = array<i64: 1, 1, 128>}, {transform_indices = @transform_8, window_bounds = array<i64: 1, 1, 32>}, {transform_indices = @transform_9, window_bounds = array<i64: 1, 2, 32>}, {transform_indices = @transform_10, window_bounds = array<i64: 1, 1, 128>}]} {
    %c0_i32 = arith.constant 0 : i32
    %0 = arith.cmpi eq, %arg0, %c0_i32 : i32
    %1 = arith.extui %0 : i1 to i32
    %c0_i32_0 = arith.constant 0 : i32
    %2 = arith.cmpi ne, %1, %c0_i32_0 : i32
    scf.if %2 {
      %c0_55 = arith.constant 0 : index
      %c0_56 = arith.constant 0 : index
      %113 = vector.load %arg7[%c0_55, %c0_56] : memref<1x32xf32, #tpu.memory_space<vmem>>, vector<1x32xf32>
      %c0_57 = arith.constant 0 : index
      %c0_58 = arith.constant 0 : index
      %114 = vector.load %arg13[%c0_57, %c0_58] : memref<1x32xf32, #tpu.memory_space<vmem>>, vector<1x32xf32>
      tpu.vector_store %arg13[%c0_57, %c0_58], %113 {strides = array<i32>} : memref<1x32xf32, #tpu.memory_space<vmem>>, vector<1x32xf32>,
      %c0_59 = arith.constant 0 : index
      %c0_60 = arith.constant 0 : index
      %115 = vector.load %arg8[%c0_59, %c0_60] : memref<2x32xf32, #tpu.memory_space<vmem>>, vector<2x32xf32>
      %c0_61 = arith.constant 0 : index
      %c0_62 = arith.constant 0 : index
      %116 = vector.load %arg14[%c0_61, %c0_62] : memref<2x32xf32, #tpu.memory_space<vmem>>, vector<2x32xf32>
      tpu.vector_store %arg14[%c0_61, %c0_62], %115 {strides = array<i32>} : memref<2x32xf32, #tpu.memory_space<vmem>>, vector<2x32xf32>,
    } else {
    }
    %c0 = arith.constant 0 : index
    %c0_1 = arith.constant 0 : index
    %c0_2 = arith.constant 0 : index
    %3 = vector.load %arg2[%c0, %c0_1, %c0_2] : memref<1x1x32xf32, #tpu.memory_space<vmem>>, vector<1x1x32xf32>
    %4 = vector.shape_cast %3 : vector<1x1x32xf32> to vector<1x32xf32>
    %c0_3 = arith.constant 0 : index
    %c0_4 = arith.constant 0 : index
    %5 = vector.load %arg13[%c0_3, %c0_4] : memref<1x32xf32, #tpu.memory_space<vmem>>, vector<1x32xf32>
    %c0_5 = arith.constant 0 : index
    %c0_6 = arith.constant 0 : index
    %6 = vector.load %arg14[%c0_5, %c0_6] : memref<2x32xf32, #tpu.memory_space<vmem>>, vector<1x32xf32>
    %c1 = arith.constant 1 : index
    %c0_7 = arith.constant 0 : index
    %7 = vector.load %arg14[%c1, %c0_7] : memref<2x32xf32, #tpu.memory_space<vmem>>, vector<1x32xf32>
    %8 = tpu.concatenate %4, %5, %6 in 1 : vector<1x32xf32>, vector<1x32xf32>, vector<1x32xf32> -> vector<1x96xf32>
    %c0_8 = arith.constant 0 : index
    %c0_9 = arith.constant 0 : index
    %9 = vector.load %arg3[%c0_8, %c0_9] : memref<176x192xf32, #tpu.memory_space<vmem>>, vector<96x192xf32>
    %cst = arith.constant dense<0.000000e+00> : vector<1x192xf32>
    %10 = tpu.matmul %8, %9, %cst {dimension_numbers = #tpu.dot_dimension_numbers<[1], [0], [0], [1], [0, 0, 1, 1], [], []>} : vector<1x96xf32>, vector<96x192xf32>, vector<1x192xf32> -> vector<1x192xf32>
    %c96 = arith.constant 96 : index
    %c0_10 = arith.constant 0 : index
    %11 = vector.load %arg3[%c96, %c0_10] : memref<176x192xf32, #tpu.memory_space<vmem>>, vector<1x192xf32>
    %12 = arith.addf %10, %11 : vector<1x192xf32>
    %13 = vector.extract_strided_slice %12 {offsets = [0, 0], sizes = [1, 32], strides = [1, 1]} : vector<1x192xf32> to vector<1x32xf32>
    %14 = vector.extract_strided_slice %12 {offsets = [0, 32], sizes = [1, 32], strides = [1, 1]} : vector<1x192xf32> to vector<1x32xf32>
    %15 = vector.extract_strided_slice %12 {offsets = [0, 64], sizes = [1, 32], strides = [1, 1]} : vector<1x192xf32> to vector<1x32xf32>
    %16 = vector.extract_strided_slice %12 {offsets = [0, 96], sizes = [1, 32], strides = [1, 1]} : vector<1x192xf32> to vector<1x32xf32>
    %17 = vector.extract_strided_slice %12 {offsets = [0, 128], sizes = [1, 32], strides = [1, 1]} : vector<1x192xf32> to vector<1x32xf32>
    %18 = vector.extract_strided_slice %12 {offsets = [0, 160], sizes = [1, 32], strides = [1, 1]} : vector<1x192xf32> to vector<1x32xf32>
    %19 = arith.addf %13, %16 : vector<1x32xf32>
    %20 = arith.negf %19 : vector<1x32xf32>
    %21 = math.exp %20 : vector<1x32xf32>
    %cst_11 = arith.constant 1.000000e+00 : f32
    %22 = vector.broadcast %cst_11 : f32 to vector<1x32xf32>
    %23 = arith.addf %22, %21 : vector<1x32xf32>
    %24 = arith.divf %22, %23 : vector<1x32xf32>
    %25 = arith.addf %14, %17 : vector<1x32xf32>
    %26 = arith.negf %25 : vector<1x32xf32>
    %27 = math.exp %26 : vector<1x32xf32>
    %cst_12 = arith.constant 1.000000e+00 : f32
    %28 = vector.broadcast %cst_12 : f32 to vector<1x32xf32>
    %29 = arith.addf %28, %27 : vector<1x32xf32>
    %30 = arith.divf %28, %29 : vector<1x32xf32>
    %31 = arith.mulf %24, %18 : vector<1x32xf32>
    %32 = arith.addf %15, %31 : vector<1x32xf32>
    %33 = math.tanh %32 : vector<1x32xf32>
    %cst_13 = arith.constant 1.000000e+00 : f32
    %34 = vector.broadcast %cst_13 : f32 to vector<1x32xf32>
    %35 = arith.subf %34, %30 : vector<1x32xf32>
    %36 = arith.mulf %35, %33 : vector<1x32xf32>
    %37 = arith.mulf %30, %6 : vector<1x32xf32>
    %38 = arith.addf %36, %37 : vector<1x32xf32>
    %39 = tpu.concatenate %38, %7 in 1 : vector<1x32xf32>, vector<1x32xf32> -> vector<1x64xf32>
    %c104 = arith.constant 104 : index
    %c0_14 = arith.constant 0 : index
    %40 = vector.load %arg3[%c104, %c0_14] : memref<176x192xf32, #tpu.memory_space<vmem>>, vector<64x192xf32>
    %cst_15 = arith.constant dense<0.000000e+00> : vector<1x192xf32>
    %41 = tpu.matmul %39, %40, %cst_15 {dimension_numbers = #tpu.dot_dimension_numbers<[1], [0], [0], [1], [0, 0, 1, 1], [], []>} : vector<1x64xf32>, vector<64x192xf32>, vector<1x192xf32> -> vector<1x192xf32>
    %c168 = arith.constant 168 : index
    %c0_16 = arith.constant 0 : index
    %42 = vector.load %arg3[%c168, %c0_16] : memref<176x192xf32, #tpu.memory_space<vmem>>, vector<1x192xf32>
    %43 = arith.addf %41, %42 : vector<1x192xf32>
    %44 = vector.extract_strided_slice %43 {offsets = [0, 0], sizes = [1, 32], strides = [1, 1]} : vector<1x192xf32> to vector<1x32xf32>
    %45 = vector.extract_strided_slice %43 {offsets = [0, 32], sizes = [1, 32], strides = [1, 1]} : vector<1x192xf32> to vector<1x32xf32>
    %46 = vector.extract_strided_slice %43 {offsets = [0, 64], sizes = [1, 32], strides = [1, 1]} : vector<1x192xf32> to vector<1x32xf32>
    %47 = vector.extract_strided_slice %43 {offsets = [0, 96], sizes = [1, 32], strides = [1, 1]} : vector<1x192xf32> to vector<1x32xf32>
    %48 = vector.extract_strided_slice %43 {offsets = [0, 128], sizes = [1, 32], strides = [1, 1]} : vector<1x192xf32> to vector<1x32xf32>
    %49 = vector.extract_strided_slice %43 {offsets = [0, 160], sizes = [1, 32], strides = [1, 1]} : vector<1x192xf32> to vector<1x32xf32>
    %50 = arith.addf %44, %47 : vector<1x32xf32>
    %51 = arith.negf %50 : vector<1x32xf32>
    %52 = math.exp %51 : vector<1x32xf32>
    %cst_17 = arith.constant 1.000000e+00 : f32
    %53 = vector.broadcast %cst_17 : f32 to vector<1x32xf32>
    %54 = arith.addf %53, %52 : vector<1x32xf32>
    %55 = arith.divf %53, %54 : vector<1x32xf32>
    %56 = arith.addf %45, %48 : vector<1x32xf32>
    %57 = arith.negf %56 : vector<1x32xf32>
    %58 = math.exp %57 : vector<1x32xf32>
    %cst_18 = arith.constant 1.000000e+00 : f32
    %59 = vector.broadcast %cst_18 : f32 to vector<1x32xf32>
    %60 = arith.addf %59, %58 : vector<1x32xf32>
    %61 = arith.divf %59, %60 : vector<1x32xf32>
    %62 = arith.mulf %55, %49 : vector<1x32xf32>
    %63 = arith.addf %46, %62 : vector<1x32xf32>
    %64 = math.tanh %63 : vector<1x32xf32>
    %cst_19 = arith.constant 1.000000e+00 : f32
    %65 = vector.broadcast %cst_19 : f32 to vector<1x32xf32>
    %66 = arith.subf %65, %61 : vector<1x32xf32>
    %67 = arith.mulf %66, %64 : vector<1x32xf32>
    %68 = arith.mulf %61, %7 : vector<1x32xf32>
    %69 = arith.addf %67, %68 : vector<1x32xf32>
    %c0_20 = arith.constant 0 : index
    %c0_21 = arith.constant 0 : index
    %70 = vector.load %arg5[%c0_20, %c0_21] : memref<40x128xf32, #tpu.memory_space<vmem>>, vector<32x128xf32>
    %cst_22 = arith.constant dense<0.000000e+00> : vector<1x128xf32>
    %71 = tpu.matmul %69, %70, %cst_22 {dimension_numbers = #tpu.dot_dimension_numbers<[1], [0], [0], [1], [0, 0, 1, 1], [], []>} : vector<1x32xf32>, vector<32x128xf32>, vector<1x128xf32> -> vector<1x128xf32>
    %c32 = arith.constant 32 : index
    %c0_23 = arith.constant 0 : index
    %72 = vector.load %arg5[%c32, %c0_23] : memref<40x128xf32, #tpu.memory_space<vmem>>, vector<1x128xf32>
    %73 = arith.addf %71, %72 : vector<1x128xf32>
    %cst_24 = arith.constant dense<0xFF800000> : vector<1xf32>
    %74 = vector.multi_reduction <maximumf>, %73, %cst_24 [1] : vector<1x128xf32> to vector<1xf32>
    %75 = vector.shape_cast %74 : vector<1xf32> to vector<1x1xf32>
    %76 = vector.broadcast %75 : vector<1x1xf32> to vector<1x128xf32>
    %77 = arith.subf %73, %76 : vector<1x128xf32>
    %78 = math.exp %77 : vector<1x128xf32>
    %cst_25 = arith.constant dense<0.000000e+00> : vector<1xf32>
    %79 = vector.multi_reduction <add>, %78, %cst_25 [1] : vector<1x128xf32> to vector<1xf32>
    %80 = vector.shape_cast %79 : vector<1xf32> to vector<1x1xf32>
    %81 = tpu.reciprocal %80 {approx = true} : vector<1x1xf32> -> vector<1x1xf32>
    %82 = vector.broadcast %81 : vector<1x1xf32> to vector<1x128xf32>
    %83 = arith.mulf %78, %82 : vector<1x128xf32>
    %c0_26 = arith.constant 0 : index
    %c0_27 = arith.constant 0 : index
    %84 = vector.load %arg6[%c0_26, %c0_27] : memref<128x32xf32, #tpu.memory_space<vmem>>, vector<128x32xf32>
    %cst_28 = arith.constant dense<0.000000e+00> : vector<1x32xf32>
    %85 = tpu.matmul %83, %84, %cst_28 {dimension_numbers = #tpu.dot_dimension_numbers<[1], [0], [0], [1], [0, 0, 1, 1], [], []>} : vector<1x128xf32>, vector<128x32xf32>, vector<1x32xf32> -> vector<1x32xf32>
    %86 = tpu.concatenate %69, %85 in 1 : vector<1x32xf32>, vector<1x32xf32> -> vector<1x64xf32>
    %c0_29 = arith.constant 0 : index
    %c0_30 = arith.constant 0 : index
    %87 = vector.load %arg4[%c0_29, %c0_30] : memref<72x128xf32, #tpu.memory_space<vmem>>, vector<64x128xf32>
    %cst_31 = arith.constant dense<0.000000e+00> : vector<1x128xf32>
    %88 = tpu.matmul %86, %87, %cst_31 {dimension_numbers = #tpu.dot_dimension_numbers<[1], [0], [0], [1], [0, 0, 1, 1], [], []>} : vector<1x64xf32>, vector<64x128xf32>, vector<1x128xf32> -> vector<1x128xf32>
    %c64 = arith.constant 64 : index
    %c0_32 = arith.constant 0 : index
    %89 = vector.load %arg4[%c64, %c0_32] : memref<72x128xf32, #tpu.memory_space<vmem>>, vector<1x128xf32>
    %90 = arith.addf %88, %89 : vector<1x128xf32>
    %cst_33 = arith.constant dense<0xFF800000> : vector<1xf32>
    %91 = vector.multi_reduction <maximumf>, %90, %cst_33 [1] : vector<1x128xf32> to vector<1xf32>
    %92 = vector.shape_cast %91 : vector<1xf32> to vector<1x1xf32>
    %93 = vector.broadcast %92 : vector<1x1xf32> to vector<1x128xf32>
    %94 = arith.subf %90, %93 : vector<1x128xf32>
    %95 = math.exp %94 : vector<1x128xf32>
    %cst_34 = arith.constant dense<0.000000e+00> : vector<1xf32>
    %96 = vector.multi_reduction <add>, %95, %cst_34 [1] : vector<1x128xf32> to vector<1xf32>
    %97 = vector.shape_cast %96 : vector<1xf32> to vector<1x1xf32>
    %98 = math.log %97 : vector<1x1xf32>
    %99 = vector.broadcast %98 : vector<1x1xf32> to vector<1x128xf32>
    %100 = arith.subf %94, %99 : vector<1x128xf32>
    %c0_35 = arith.constant 0 : index
    %c0_36 = arith.constant 0 : index
    %101 = vector.load %arg13[%c0_35, %c0_36] : memref<1x32xf32, #tpu.memory_space<vmem>>, vector<1x32xf32>
    tpu.vector_store %arg13[%c0_35, %c0_36], %85 {strides = array<i32>} : memref<1x32xf32, #tpu.memory_space<vmem>>, vector<1x32xf32>,
    %c0_37 = arith.constant 0 : index
    %c0_38 = arith.constant 0 : index
    %102 = vector.load %arg14[%c0_37, %c0_38] : memref<2x32xf32, #tpu.memory_space<vmem>>, vector<1x32xf32>
    tpu.vector_store %arg14[%c0_37, %c0_38], %38 {strides = array<i32>} : memref<2x32xf32, #tpu.memory_space<vmem>>, vector<1x32xf32>,
    %c1_39 = arith.constant 1 : index
    %c0_40 = arith.constant 0 : index
    %103 = vector.load %arg14[%c1_39, %c0_40] : memref<2x32xf32, #tpu.memory_space<vmem>>, vector<1x32xf32>
    tpu.vector_store %arg14[%c1_39, %c0_40], %69 {strides = array<i32>} : memref<2x32xf32, #tpu.memory_space<vmem>>, vector<1x32xf32>,
    %104 = vector.shape_cast %100 : vector<1x128xf32> to vector<1x1x128xf32>
    %c0_41 = arith.constant 0 : index
    %c0_42 = arith.constant 0 : index
    %c0_43 = arith.constant 0 : index
    %105 = vector.load %arg9[%c0_41, %c0_42, %c0_43] : memref<1x1x128xf32, #tpu.memory_space<vmem>>, vector<1x1x128xf32>
    tpu.vector_store %arg9[%c0_41, %c0_42, %c0_43], %104 {strides = array<i32>} : memref<1x1x128xf32, #tpu.memory_space<vmem>>, vector<1x1x128xf32>,
    %106 = vector.shape_cast %83 : vector<1x128xf32> to vector<1x1x128xf32>
    %c0_44 = arith.constant 0 : index
    %c0_45 = arith.constant 0 : index
    %c0_46 = arith.constant 0 : index
    %107 = vector.load %arg12[%c0_44, %c0_45, %c0_46] : memref<1x1x128xf32, #tpu.memory_space<vmem>>, vector<1x1x128xf32>
    tpu.vector_store %arg12[%c0_44, %c0_45, %c0_46], %106 {strides = array<i32>} : memref<1x1x128xf32, #tpu.memory_space<vmem>>, vector<1x1x128xf32>,
    %108 = vector.shape_cast %85 : vector<1x32xf32> to vector<1x1x32xf32>
    %c0_47 = arith.constant 0 : index
    %c0_48 = arith.constant 0 : index
    %c0_49 = arith.constant 0 : index
    %109 = vector.load %arg10[%c0_47, %c0_48, %c0_49] : memref<1x1x32xf32, #tpu.memory_space<vmem>>, vector<1x1x32xf32>
    tpu.vector_store %arg10[%c0_47, %c0_48, %c0_49], %108 {strides = array<i32>} : memref<1x1x32xf32, #tpu.memory_space<vmem>>, vector<1x1x32xf32>,
    %c0_50 = arith.constant 0 : index
    %c0_51 = arith.constant 0 : index
    %110 = vector.load %arg14[%c0_50, %c0_51] : memref<2x32xf32, #tpu.memory_space<vmem>>, vector<2x32xf32>
    %111 = vector.shape_cast %110 : vector<2x32xf32> to vector<1x2x32xf32>
    %c0_52 = arith.constant 0 : index
    %c0_53 = arith.constant 0 : index
    %c0_54 = arith.constant 0 : index
    %112 = vector.load %arg11[%c0_52, %c0_53, %c0_54] : memref<1x2x32xf32, #tpu.memory_space<vmem>>, vector<1x2x32xf32>
    tpu.vector_store %arg11[%c0_52, %c0_53, %c0_54], %111 {strides = array<i32>} : memref<1x2x32xf32, #tpu.memory_space<vmem>>, vector<1x2x32xf32>,
    return
  }
  func.func @transform_0(%arg0: i32, %arg1: memref<3xi32, #tpu.memory_space<smem>>) -> (i32, i32, i32) {
    %0 = arith.index_cast %arg0 : i32 to index
    %1 = memref.load %arg1[%0] : memref<3xi32, #tpu.memory_space<smem>>
    %c0_i32 = arith.constant 0 : i32
    %c0_i32_0 = arith.constant 0 : i32
    %c0_i32_1 = arith.constant 0 : i32
    return %1, %c0_i32, %c0_i32_0 : i32, i32, i32
  }
  func.func @transform_1(%arg0: i32, %arg1: memref<3xi32, #tpu.memory_space<smem>>) -> (i32, i32) {
    %c0_i32 = arith.constant 0 : i32
    %c0_i32_0 = arith.constant 0 : i32
    %c0_i32_1 = arith.constant 0 : i32
    return %c0_i32, %c0_i32_0 : i32, i32
  }
  func.func @transform_2(%arg0: i32, %arg1: memref<3xi32, #tpu.memory_space<smem>>) -> (i32, i32) {
    %c0_i32 = arith.constant 0 : i32
    %c0_i32_0 = arith.constant 0 : i32
    %c0_i32_1 = arith.constant 0 : i32
    return %c0_i32, %c0_i32_0 : i32, i32
  }
  func.func @transform_3(%arg0: i32, %arg1: memref<3xi32, #tpu.memory_space<smem>>) -> (i32, i32) {
    %c0_i32 = arith.constant 0 : i32
    %c0_i32_0 = arith.constant 0 : i32
    %c0_i32_1 = arith.constant 0 : i32
    return %c0_i32, %c0_i32_0 : i32, i32
  }
  func.func @transform_4(%arg0: i32, %arg1: memref<3xi32, #tpu.memory_space<smem>>) -> (i32, i32) {
    %c0_i32 = arith.constant 0 : i32
    %c0_i32_0 = arith.constant 0 : i32
    %c0_i32_1 = arith.constant 0 : i32
    return %c0_i32, %c0_i32_0 : i32, i32
  }
  func.func @transform_5(%arg0: i32, %arg1: memref<3xi32, #tpu.memory_space<smem>>) -> (i32, i32) {
    %c0_i32 = arith.constant 0 : i32
    %c0_i32_0 = arith.constant 0 : i32
    %c0_i32_1 = arith.constant 0 : i32
    return %c0_i32, %c0_i32_0 : i32, i32
  }
  func.func @transform_6(%arg0: i32, %arg1: memref<3xi32, #tpu.memory_space<smem>>) -> (i32, i32) {
    %c0_i32 = arith.constant 0 : i32
    %c0_i32_0 = arith.constant 0 : i32
    %c0_i32_1 = arith.constant 0 : i32
    return %c0_i32, %c0_i32_0 : i32, i32
  }
  func.func @transform_7(%arg0: i32, %arg1: memref<3xi32, #tpu.memory_space<smem>>) -> (i32, i32, i32) {
    %c0_i32 = arith.constant 0 : i32
    %c0_i32_0 = arith.constant 0 : i32
    %c0_i32_1 = arith.constant 0 : i32
    return %arg0, %c0_i32, %c0_i32_0 : i32, i32, i32
  }
  func.func @transform_8(%arg0: i32, %arg1: memref<3xi32, #tpu.memory_space<smem>>) -> (i32, i32, i32) {
    %c0_i32 = arith.constant 0 : i32
    %c0_i32_0 = arith.constant 0 : i32
    %c0_i32_1 = arith.constant 0 : i32
    return %arg0, %c0_i32, %c0_i32_0 : i32, i32, i32
  }
  func.func @transform_9(%arg0: i32, %arg1: memref<3xi32, #tpu.memory_space<smem>>) -> (i32, i32, i32) {
    %c0_i32 = arith.constant 0 : i32
    %c0_i32_0 = arith.constant 0 : i32
    %c0_i32_1 = arith.constant 0 : i32
    return %arg0, %c0_i32, %c0_i32_0 : i32, i32, i32
  }
  func.func @transform_10(%arg0: i32, %arg1: memref<3xi32, #tpu.memory_space<smem>>) -> (i32, i32, i32) {
    %c0_i32 = arith.constant 0 : i32
    %c0_i32_0 = arith.constant 0 : i32
    %c0_i32_1 = arith.constant 0 : i32
    return %arg0, %c0_i32, %c0_i32_0 : i32, i32, i32
  }
}

</mosaic_0001>

<bundles_post_ra>
// kernel: tpu_custom_call.1
= control target key start
LH: loop header
LB: loop body
LE: loop exit
PB: predicated region body
PF: predicated region fallthrough
CT: control target
= control target key end

     0   :  { %s2122_s0 = inlined_call_operand.vmem [shape: s32[3], index: 0, kind: input, shape index: {}]   ;;  %s2123_s1 = inlined_call_operand.vmem [shape: f32[64,1,32], index: 1, kind: input, shape index: {}]   ;;  %s2124_s2 = inlined_call_operand.hbm [shape: f32[176,192], index: 2, kind: input, shape index: {}]   ;;  %s2125_s3 = inlined_call_operand.vmem [shape: f32[72,128], index: 3, kind: input, shape index: {}]   ;;  %s2126_s4 = inlined_call_operand.vmem [shape: f32[40,128], index: 4, kind: input, shape index: {}]   ;;  %s2127_s5 = inlined_call_operand.vmem [shape: f32[128,32], index: 5, kind: input, shape index: {}]   ;;  %s2128_s6 = inlined_call_operand.vmem [shape: f32[1,32], index: 6, kind: input, shape index: {}]   ;;  %s2129_s7 = inlined_call_operand.vmem [shape: f32[2,32], index: 7, kind: input, shape index: {}]   ;;  %s2130_s8 = inlined_call_operand.hbm [shape: f32[3,1,128], index: 8, kind: output, shape index: {0}]   ;;  %s2131_s9 = inlined_call_operand.hbm [shape: f32[3,1,32], index: 9, kind: output, shape index: {1}]   ;;  %s2132_s10 = inlined_call_operand.hbm [shape: f32[3,2,32], index: 10, kind: output, shape index: {2}]   ;;  %s2133_s11 = inlined_call_operand.hbm [shape: f32[3,1,128], index: 11, kind: output, shape index: {3}]  }
   0x1   :  { %2137 = sst [smem:[#allocation22_spill]] %s2123_s1  ;;  %s17_s19 = sshll.u32 %s2122_s0, 4  ;;  %s18_s19 = int_to_ptr.vmem [resolvable:$true] %s17_s19 }
   0x2   :  { %2138 = sst [smem:[#allocation23_spill]] %s2124_s2  ;;  %s1466_s20 = scalar_lea.vmem %s18_s19, 16 }
   0x3   :  { %2139 = sst [smem:[#allocation24_spill]] %s2125_s3  ;;  %p1467_p0 = scmp.ne.s32.totalorder %s18_s19, %s1466_s20 }
   0x4   :  { %p1471_p1 = scmp.lt.s32.totalorder %s18_s19, %s18_s19  ;;  %p1472_p2 = scmp.lt.s32.totalorder %s1466_s20, %s1466_s20 }
   0x6   :  { %p1473_p3 = por %p1472_p2, %p1471_p1 }
   0x8   :  { %p1474_p4 = pnand %p1473_p3, %p1467_p0 }
   0xa   :  { %1477 = shalt.err (!%p1474_p4)  }
   0xb   :  { %s1658_s21 = smov [#allocation5]  }
   0xc   :  { %20 = dma.vmem_to_smem %s18_s19, 16, %s1658_s21, [#allocation4] }
   0xd   :  { %1624 = dma.done.wait [#allocation4], 16 }
   0xe   :  { %1625 = vsyncadd [#allocation4], 4294967280 }
   0xf   :  { %22 = sfence }
  0x10   :  { %23 = vsyncpa [#allocation7], 0 }
  0x11   :  { %24 = vsyncpa [#allocation8], 0 }
  0x12   :  { %26 = vsyncpa [#allocation8 + $0x1], 0 }
  0x13   :  { %27 = vsyncpa [#allocation11], 0 }
  0x14   :  { %29 = vsyncpa [#allocation11 + $0x1], 0 }
  0x15   :  { %30 = vsyncpa [#allocation14], 0 }
  0x16   :  { %32 = vsyncpa [#allocation14 + $0x1], 0  ;;  %s1734_s0 = smov 0   ;;  %s1736_s22 = smov 0  }
  0x17   :  { %s1738_s23 = smov 0   ;;  %s1740_s24 = smov 0  }
  0x18 LB: > { %2140 = sst [smem:[#allocation20_spill]] %s1652_s23  ;;  %s1755_s25 = sadd.s32 4294967295, %s1656_s24   ;;  %s1656_s24 = sphi %s1740_s24, %s2159_s24   ;;  %s1652_s23 = sphi %s1738_s23, %s2156_s23   ;;  %s1648_s22 = sphi %s1736_s22, %s2158_s22   ;;  %s1644_s0 = sphi %s1734_s0, %s2157_s0  }
  0x19   : > { %s2134_s26 = sadd.s32 4294967294, %s1656_s24   ;;  %s1759_s27 = sadd.s32 1, %s1656_s24  }
  0x1a   : > { %s199_s28 = sadd.s32 1, %s1652_s23  ;;  %s196_s29 = ssub.s32 %s1656_s24, %s1759_s27 }
  0x1b   : > { %p209_p5 = scmp.ne.s32.totalorder %s1652_s23, %s1648_s22  ;;  %p197_p6 = scmp.eq.s32.totalorder %s196_s29, 0 }
  0x1c   : > { %p210_p7 = scmp.eq.s32.totalorder %s1755_s25, 2  ;;  %p215_p8 = scmp.ne.s32.totalorder %s1648_s22, %s1644_s0 }
  0x1d   : > { %p216_p9 = scmp.eq.s32.totalorder %s2134_s26, 2  ;;  %p1246_p12 = scmp.ge.s32.totalorder %s1656_s24, 1 }
  0x1e   : > { %s1772_s30 = scalar_select %p197_p6, %s1652_s23, %s199_s28  }
  0x1f   : > { %p1774_p10 = por %p210_p7, %p209_p5  ;;  %p1778_p11 = por %p216_p9, %p215_p8 }
  0x20   : > { %2141 = sst [smem:[#allocation21_spill]] %s1772_s30  ;;  %p301_p13 = scmp.lt.s32.totalorder %s1656_s24, 4 }
  0x21   : > { %s2143_s13 = scalar_select %p1778_p11, 1, 0 }
  0x22   : > { %p1394_p1 = scmp.eq.s32.totalorder %s1755_s25, 0  ;;  %p1786_p2 = pnand %p1246_p12, %p301_p13 }
  0x23   : > { %s1659_s15 = smov [#allocation6]  }
  0x24   : > { %s313_s16 = sshll.u32 %s1659_s15, 4  ;;  %p1377_p3 = pneg %p1786_p2  ;;  %s314_s16 = int_to_ptr.vmem [resolvable:$true] %s313_s16 }
  0x25   : > { %s1489_s17 = scalar_lea.vmem %s314_s16, 5632  ;;  %p1497_p9 = scmp.lt.s32.totalorder %s314_s16, %s314_s16 }
  0x26   : > { %p1378_p4 = pnand %p1394_p1, %p1377_p3  ;;  %p1490_p6 = scmp.ne.s32.totalorder %s314_s16, %s1489_s17 }
  0x27   : > { %p1498_p0 = scmp.lt.s32.totalorder %s1489_s17, %s1489_s17 }
  0x28   : > { %p1480_p5 = pneg %p1378_p4 }
  0x29   : > { %p1499_p11 = por %p1498_p0, %p1497_p9 }
  0x2a   : > { %p1492_p7 = pnand %p1490_p6, %p1480_p5 }
  0x2c   : > { %p1493_p8 = pneg %p1492_p7 }
  0x2e   : > { %p1500_p12 = pnand %p1499_p11, %p1493_p8 }
  0x30   : > { %1503 = shalt.err (!%p1500_p12)
}
  0x31   : > { %s1660_s18 = smov 256   ;;  %s1661_s19 = smov 16  }
  0x32   : > { %s2145_s2 = sld [smem:[#allocation23_spill]] }
  0x34   : > { %352 = sbr.rel (%p1786_p2) target bundleno = 2958 (0xb8e), region = 48 }
  0x38   : > { %1380 = dma.hbm_to_vmem [thread:$0]  (!%p1378_p4), %s2145_s2, 5632, %s314_s16, [#allocation7], %s1660_s18, %s1660_s18, %s1661_s19  }
  0x39   : > { %1627 = dma.done.wait (%p1394_p1), [#allocation7], 5632  }
  0x3a   : > { %1629 = vsyncadd (%p1394_p1), [#allocation7], 4294961664  ;;  %s1804_s28 = sand.u32 1, %s1648_s22   ;;  %s401_s29 = sld [smem:[#allocation5 + %s1755_s25]] }
  0x3b   : > { %s1251_s15 = sshll.u32 %s1804_s28, 1  ;;  %s2146_s1 = sld [smem:[#allocation22_spill]] }
  0x3c   : > { %s387_s19 = scalar_lea.vmem [#allocation10], %s1804_s28  ;;  %s1816_s20 = scalar_lea.vmem [#allocation12], %s1251_s15 }
  0x3d   : > { %s2136_s21 = scalar_lea.vmem [#allocation13], %s1804_s28  ;;  %p2147_p13 = scmp.ne.s32.totalorder %s1755_s25, 0 }
  0x3f   : > { %409 = sbr.rel (%p2147_p13) target bundleno = 71 (0x47), region = 56 }
  0x40   : > { %p402_p11 = scmp.lt.s32.totalorder %s401_s29, 63 }
  0x42   : > { %s2161_s29 = smov (!%p402_p11, %s401_s29), 63 }
  0x43   : > { %s404_s17 = scalar_lea.vmem %s2146_s1, %s2161_s29 }
  0x44   : > { %v410_v0 = vld [vmem:[%s2128_s6] sm:$0x1]  ;;  %vm411_vm0 = vcmask 253952   ;;  %vm414_vm1 = vcmask 254976  }
  0x45   : > { %v413_v1 = vld [vmem:[%s2129_s7] sm:$0x3]  ;;  %412 = vst.msk [vmem:[#allocation2] sm:$0x1] %vm411_vm0, %v410_v0 }
  0x46   : > { %415 = vst.msk [vmem:[#allocation3] sm:$0x3] %vm414_vm1, %v413_v1 }
  0x47 PF: > { %s1662_s15 = smov 32   ;;  %v459_v3 = vld [vmem:[#allocation6 + $0xb8] sm:$0xff]  ;;  %v458_v4 = vld [vmem:[#allocation6 + $0xb0] sm:$0xff]  ;;  %v457_v5 = vld [vmem:[#allocation6 + $0xa8] sm:$0xff]  ;;  %v1663_v8 = vmov 0.0   ;;  %s1664_s2 = smov 64   ;;  %v463_v34 = vlaneseq }
  0x48   : > { %485 = vmatprep.subr.mxu0 %v459_v3  ;;  %v456_v7 = vld [vmem:[#allocation6 + $0xa0] sm:$0xff]  ;;  %541 = vmatprep.mubr.f32.mxu0 %v1663_v8  ;;  %v455_v9 = vld [vmem:[#allocation6 + $0x98] sm:$0xff]  ;;  %v454_v10 = vld [vmem:[#allocation6 + $0x90] sm:$0xff]  ;;  %vm432_vm2 = vcmask 261120   ;;  %vm434_vm3 = vcmask 523264   ;;  %vm473_vm4 = vcmask 785408  }
  0x49   : > { %486 = vmatpush1.msra.mxu0 %v458_v4  ;;  %696 = vmatprep.mubr.f32.mxu1 %v1663_v8  ;;  %v453_v11 = vld [vmem:[#allocation6 + $0x88] sm:$0xff]  ;;  %v452_v12 = vld [vmem:[#allocation6 + $0x80] sm:$0xff]  ;;  %v451_v13 = vld [vmem:[#allocation6 + $0x78] sm:$0xff]  ;;  %v1842_v35 = vshrl.u32 %v463_v34, 7  ;;  %s1665_s30 = smov 96   ;;  %vm1021_vm5 = vcmask 253952  }
  0x4a   : > { %487 = vmatprep.subr.mxu0 %v457_v5  ;;  %v450_v14 = vld [vmem:[#allocation6 + $0x70] sm:$0xff]  ;;  %v449_v15 = vld [vmem:[#allocation6 + $0x68] sm:$0xff]  ;;  %v448_v16 = vld [vmem:[#allocation6 + $0x60] sm:$0xff]  ;;  %vm1666_vm6 = vmmov 0   ;;  %vm1029_vm7 = vcmask 254976   ;;  %vm823_vm8 = vcmask 1040384  }
  0x4b   : > { %488 = vmatpush1.msra.mxu0 %v456_v7  ;;  %v447_v17 = vld [vmem:[#allocation6 + $0x58] sm:$0xff]  ;;  %v446_v18 = vld [vmem:[#allocation6 + $0x50] sm:$0xff]  ;;  %v445_v19 = vld [vmem:[#allocation6 + $0x48] sm:$0xff]  ;;  %v465_v36 = vsub.s32 0, %v1842_v35  ;;  %v469_v39 = vsub.s32 1, %v1842_v35  ;;  %s2149_s3 = sld [smem:[#allocation24_spill]] }
  0x4c   : > { %v1253_v2 = vld [vmem:[#allocation2] ss:$0 sm:$0xff]  ;;  %489 = vmatprep.subr.mxu0 %v455_v9  ;;  %v444_v20 = vld [vmem:[#allocation6 + $0x40] sm:$0xff]  ;;  %v442_v22 = vld [vmem:[#allocation6 + $0x30] sm:$0xff]  ;;  %s2021_s23 = sshll.u32 %s1755_s25, 4  ;;  %s1070_s14 = sshll.u32 %s387_s19, 4  ;;  %s1071_s14 = int_to_ptr.vmem [resolvable:$true] %s1070_s14 }
  0x4d   : > { %425 = vrot.lane.b32.xlu0 %v1253_v2, %s1662_s15  ;;  %v1828_v6 = vld [vmem:[#allocation3] sm:$0x1]  ;;  %490 = vmatpush1.msra.mxu0 %v454_v10  ;;  %v441_v23 = vld [vmem:[#allocation6 + $0x28] sm:$0xff]  ;;  %v440_v24 = vld [vmem:[#allocation6 + $0x20] sm:$0xff]  ;;  %s1068_s29 = scalar_lea.hbm %s2131_s9, %s2021_s23 }
  0x4e   : > { %491 = vmatprep.subr.mxu0 %v453_v11  ;;  %v443_v21 = vld [vmem:[#allocation6 + $0x38] sm:$0xff]  ;;  %v438_v26 = vld [vmem:[#allocation6 + $0x10] sm:$0xff]  ;;  %v437_v27 = vld [vmem:[#allocation6 + $0x8] sm:$0xff] }
  0x4f   : > { %492 = vmatpush1.msra.mxu0 %v452_v12  ;;  %v439_v25 = vld [vmem:[#allocation6 + $0x18] sm:$0xff]  ;;  %v436_v28 = vld [vmem:[#allocation6] sm:$0xff]  ;;  %v615_v56 = vld [vmem:[#allocation6 + $0x148] sm:$0xff] }
  0x50   : > { %493 = vmatprep.subr.mxu0 %v451_v13  ;;  %v416_v30 = vld [vmem:[%s404_s17] sm:$0x1]  ;;  %v461_v37 = vld [vmem:[#allocation6 + $0xc0] ss:$8 sm:$0x3]  ;;  %648 = vmatprep.subr.mxu1 %v615_v56  ;;  %v612_v59 = vld [vmem:[#allocation6 + $0x130] sm:$0xff] }
  0x51   : > { %429 = vrot.lane.b32.xlu0 %v1828_v6, %s1664_s2  ;;  %494 = vmatpush1.msra.mxu0 %v450_v14  ;;  %v466_v38 = vrot.slane %v461_v37, %v465_v36  ;;  %v470_v42 = vrot.slane %v461_v37, %v469_v39  ;;  %v419_v55 = vld [vmem:[#allocation3 + $0x1] sm:$0x1]  ;;  %v614_v57 = vld [vmem:[#allocation6 + $0x140] sm:$0xff]  ;;  %v611_v60 = vld [vmem:[#allocation6 + $0x128] sm:$0xff]  ;;  %s1667_s17 = smov [#allocation10]  }
  0x52   : > { %495 = vmatprep.subr.mxu0 %v449_v15  ;;  %v613_v58 = vld [vmem:[#allocation6 + $0x138] sm:$0xff]  ;;  %649 = vmatpush1.msra.mxu1 %v614_v57  ;;  %v610_v61 = vld [vmem:[#allocation6 + $0x120] sm:$0xff]  ;;  %v608_v63 = vld [vmem:[#allocation6 + $0x110] sm:$0xff]  ;;  %s1508_s18 = sshll.u32 %s1667_s17, 4  ;;  %s1509_s18 = int_to_ptr.vmem [resolvable:$false] %s1508_s18 }
  0x53   : > { %496 = vmatpush1.msra.mxu0 %v448_v16  ;;  %650 = vmatprep.subr.mxu1 %v613_v58  ;;  %v609_v62 = vld [vmem:[#allocation6 + $0x118] sm:$0xff]  ;;  %v607_v0 = vld [vmem:[#allocation6 + $0x108] sm:$0xff]  ;;  %v606_v1 = vld [vmem:[#allocation6 + $0x100] sm:$0xff]  ;;  %p1511_p3 = scmp.lt.s32.totalorder %s1071_s14, %s1509_s18 }
  0x54   : > { %497 = vmatprep.subr.mxu0 %v447_v17  ;;  %651 = vmatpush1.msra.mxu1 %v612_v59  ;;  %v605_v3 = vld [vmem:[#allocation6 + $0xf8] sm:$0xff]  ;;  %v604_v4 = vld [vmem:[#allocation6 + $0xf0] sm:$0xff]  ;;  %v603_v5 = vld [vmem:[#allocation6 + $0xe8] sm:$0xff] }
  0x55   : > { %498 = vmatpush1.msra.mxu0 %v446_v18  ;;  %652 = vmatprep.subr.mxu1 %v611_v60  ;;  %v601_v7 = vld [vmem:[#allocation6 + $0xd8] sm:$0xff]  ;;  %v600_v14 = vld [vmem:[#allocation6 + $0xd0] sm:$0xff] }
  0x56   : > { %499 = vmatprep.subr.mxu0 %v445_v19  ;;  %653 = vmatpush1.msra.mxu1 %v610_v61  ;;  %v747_v60 = vld [vmem:[%s2126_s4 + $0x20] sm:$0x1] }
  0x57   : > { %500 = vmatpush1.msra.mxu0 %v444_v20  ;;  %654 = vmatprep.subr.mxu1 %v609_v62 }
  0x58   : > { %501 = vmatprep.subr.mxu0 %v443_v21  ;;  %655 = vmatpush1.msra.mxu1 %v608_v63 }
  0x59   : > { %502 = vmatpush1.msra.mxu0 %v442_v22  ;;  %656 = vmatprep.subr.mxu1 %v607_v0 }
  0x5a   : > { %503 = vmatprep.subr.mxu0 %v441_v23  ;;  %657 = vmatpush1.msra.mxu1 %v606_v1  ;;  %v850_v1 = vld [vmem:[%s2127_s5 + $0x78] sm:$0xff] }
  0x5b   : > { %504 = vmatpush1.msra.mxu0 %v440_v24  ;;  %658 = vmatprep.subr.mxu1 %v605_v3  ;;  %v848_v3 = vld [vmem:[%s2127_s5 + $0x68] sm:$0xff] }
  0x5c   : > { %505 = vmatprep.subr.mxu0 %v439_v25  ;;  %659 = vmatpush1.msra.mxu1 %v604_v4  ;;  %v617_v25 = vld [vmem:[#allocation6 + $0x150] ss:$8 sm:$0x3]  ;;  %v847_v4 = vld [vmem:[%s2127_s5 + $0x60] sm:$0xff] }
  0x5d   : > { %506 = vmatpush1.msra.mxu0 %v438_v26  ;;  %660 = vmatprep.subr.mxu1 %v603_v5  ;;  %v622_v26 = vrot.slane %v617_v25, %v465_v36  ;;  %v846_v5 = vld [vmem:[%s2127_s5 + $0x58] sm:$0xff] }
  0x5e   : > { %507 = vmatprep.subr.mxu0 %v437_v27  ;;  %v626_v27 = vrot.slane %v617_v25, %v469_v39 }
  0x5f   : > { %508 = vmatpush1.msra.mxu0 %v436_v28 }
  0x60   : > { %1311 = vmatprep.subr.mxu0 %v1663_v8 }
  0xbf   : > { %v426_v29 = vpop.permute.xlu0 %425 }
  0xc0   : > { %v433_v31 = vsel %vm432_vm2, %v416_v30, %v426_v29 }
  0xc3   : > { %v430_v32 = vpop.permute.xlu0 %429 }
  0xc4   : > { %v435_v33 = vsel %vm434_vm3, %v433_v31, %v430_v32 }
  0xc5   : > { %1254 = vmatmul.mubr.msk.f32.vlgmr.msra.gmra.mxu0 %vm473_vm4, %v435_v33 }
  0xc6   : > { %1343 = vmatprep.mubr.msk.f32.mxu0 %vm1666_vm6, %v1663_v8  ;;  %1312 = vmatpush3.msra.mxu0 %v850_v1 }
  0xc7   : > { %1313 = vmatprep.subr.mxu0 %v1663_v8 }
 0x185   : > { %v543_v40 = vpop.f32.mrf.mxu0 }
 0x186   : > { %v544_v41 = vadd.f32 %v543_v40, %v466_v38 }
 0x187   : > { %v545_v43 = vpop.f32.mrf.mxu0 }
 0x188   : > { %549 = vrot.lane.b32.xlu1 %v544_v41, %s1662_s15  ;;  %v546_v44 = vadd.f32 %v545_v43, %v470_v42  ;;  %v746_v42 = vld [vmem:[%s2126_s4 + $0x18] sm:$0xff]  ;;  %v745_v43 = vld [vmem:[%s2126_s4 + $0x10] sm:$0xff] }
 0x18c   : > { %570 = vrot.lane.b32.xlu1 %v546_v44, %s1665_s30 }
 0x190   : > { %560 = vrot.lane.b32.xlu1 %v546_v44, %s1662_s15  ;;  %v744_v44 = vld [vmem:[%s2126_s4 + $0x8] sm:$0xff] }
 0x194   : > { %586 = vrot.lane.b32.xlu1 %v1828_v6, %s1662_s15  ;;  %v602_v6 = vld [vmem:[#allocation6 + $0xe0] sm:$0xff] }
 0x195   : > { %661 = vmatpush1.msra.mxu1 %v602_v6  ;;  %v845_v6 = vld [vmem:[%s2127_s5 + $0x50] sm:$0xff] }
 0x196   : > { %662 = vmatprep.subr.mxu1 %v601_v7  ;;  %v844_v7 = vld [vmem:[%s2127_s5 + $0x48] sm:$0xff] }
 0x197   : > { %663 = vmatpush1.msra.mxu1 %v600_v14 }
 0x198   : > { %596 = vrot.lane.b32.xlu1 %v419_v55, %s1662_s15  ;;  %1300 = vmatprep.subr.mxu1 %v1663_v8 }
 0x1fa   : > { %v550_v45 = vpop.permute.xlu1 %549 }
 0x1fb   : > { %v552_v46 = vadd.f32 %v550_v45, %v544_v41  ;;  %v743_v45 = vld [vmem:[%s2126_s4] sm:$0xff] }
 0x1fd   : > { %v1255_v47 = vmul.f32 -1.442695, %v552_v46 }
 0x1fe   : > { %v571_v51 = vpop.permute.xlu1 %570 }
 0x1ff   : > { %1438 = vpow2.f32 %v1255_v47 }
 0x202   : > { %v561_v9 = vpop.permute.xlu1 %560 }
 0x203   : > { %v563_v10 = vadd.f32 %v561_v9, %v544_v41  ;;  %v843_v9 = vld [vmem:[%s2127_s5 + $0x40] sm:$0xff] }
 0x205   : > { %v1256_v11 = vmul.f32 -1.442695, %v563_v10 }
 0x206   : > { %v587_v16 = vpop.permute.xlu1 %586 }
 0x20a   : > { %v597_v22 = vpop.permute.xlu1 %596 }
 0x20c   : > { %v1439_v48 = vpop.eup %1438 }
 0x20d   : > { %v556_v49 = vadd.f32 1.0, %v1439_v48 }
 0x20f   : > { %1440 = vrcp.f32 %v556_v49 }
 0x21c   : > { %v1441_v50 = vpop.eup %1440 }
 0x21d   : > { %v573_v52 = vmul.f32 %v1441_v50, %v571_v51 }
 0x21f   : > { %575 = vrot.lane.b32.xlu0 %v573_v52, %s1664_s2 }
 0x291   : > { %v576_v53 = vpop.permute.xlu0 %575 }
 0x292   : > { %v578_v54 = vadd.f32 %v576_v53, %v544_v41 }
 0x294   : > { %1442 = vtanh.f32 %v578_v54 }
 0x295   : > { %1444 = vpow2.f32 %v1256_v11 }
 0x2a1   : > { %v1443_v2 = vpop.eup %1442 }
 0x2a2   : > { %582 = vrot.lane.b32.xlu0 %v1443_v2, %s1665_s30  ;;  %v1445_v12 = vpop.eup %1444  ;;  %v849_v2 = vld [vmem:[%s2127_s5 + $0x70] sm:$0xff] }
 0x2a3   : > { %v567_v13 = vadd.f32 1.0, %v1445_v12  ;;  %1314 = vmatpush3.msra.mxu0 %v849_v2 }
 0x2a4   : > { %1315 = vmatprep.subr.mxu0 %v1663_v8 }
 0x2a5   : > { %1446 = vrcp.f32 %v567_v13  ;;  %1316 = vmatpush3.msra.mxu0 %v848_v3 }
 0x2a6   : > { %1317 = vmatprep.subr.mxu0 %v1663_v8 }
 0x2a7   : > { %1318 = vmatpush3.msra.mxu0 %v847_v4 }
 0x2a8   : > { %1319 = vmatprep.subr.mxu0 %v1663_v8 }
 0x2a9   : > { %1320 = vmatpush3.msra.mxu0 %v846_v5 }
 0x2aa   : > { %1321 = vmatprep.subr.mxu0 %v1663_v8 }
 0x2ab   : > { %1322 = vmatpush3.msra.mxu0 %v845_v6 }
 0x2ac   : > { %1323 = vmatprep.subr.mxu0 %v1663_v8 }
 0x2ad   : > { %1324 = vmatpush3.msra.mxu0 %v844_v7 }
 0x2ae   : > { %1325 = vmatprep.subr.mxu0 %v1663_v8 }
 0x2af   : > { %1326 = vmatpush3.msra.mxu0 %v843_v9 }
 0x2b0   : > { %1327 = vmatprep.subr.mxu0 %v1663_v8 }
 0x2b2   : > { %v1447_v15 = vpop.eup %1446 }
 0x2b3   : > { %v580_v17 = vsub.f32 1.0, %v1447_v15  ;;  %v589_v19 = vmul.f32 %v1447_v15, %v587_v16  ;;  %v842_v15 = vld [vmem:[%s2127_s5 + $0x38] sm:$0xff]  ;;  %v841_v16 = vld [vmem:[%s2127_s5 + $0x30] sm:$0xff] }
 0x2b4   : > { %1328 = vmatpush3.msra.mxu0 %v842_v15 }
 0x2b5   : > { %1329 = vmatprep.subr.mxu0 %v1663_v8 }
 0x2b6   : > { %1330 = vmatpush3.msra.mxu0 %v841_v16 }
 0x2b7   : > { %1331 = vmatprep.subr.mxu0 %v1663_v8 }
 0x314   : > { %v583_v18 = vpop.permute.xlu0 %582 }
 0x315   : > { %v585_v20 = vmul.f32 %v583_v18, %v580_v17  ;;  %v840_v17 = vld [vmem:[%s2127_s5 + $0x28] sm:$0xff]  ;;  %v839_v18 = vld [vmem:[%s2127_s5 + $0x20] sm:$0xff] }
 0x316   : > { %1332 = vmatpush3.msra.mxu0 %v840_v17 }
 0x317   : > { %v590_v21 = vadd.f32 %v589_v19, %v585_v20  ;;  %1333 = vmatprep.subr.mxu0 %v1663_v8  ;;  %v838_v19 = vld [vmem:[%s2127_s5 + $0x18] sm:$0xff]  ;;  %v837_v20 = vld [vmem:[%s2127_s5 + $0x10] sm:$0xff] }
 0x318   : > { %1334 = vmatpush3.msra.mxu0 %v839_v18 }
 0x319   : > { %592 = vrot.lane.b32.xlu0 %v590_v21, %s1665_s30  ;;  %1335 = vmatprep.subr.mxu0 %v1663_v8  ;;  %v836_v21 = vld [vmem:[%s2127_s5 + $0x8] sm:$0xff] }
 0x31a   : > { %1336 = vmatpush3.msra.mxu0 %v838_v19 }
 0x31b   : > { %1337 = vmatprep.subr.mxu0 %v1663_v8 }
 0x31c   : > { %1338 = vmatpush3.msra.mxu0 %v837_v20 }
 0x31d   : > { %1339 = vmatprep.subr.mxu0 %v1663_v8 }
 0x31e   : > { %1340 = vmatpush3.msra.mxu0 %v836_v21 }
 0x31f   : > { %1341 = vmatprep.subr.mxu0 %v1663_v8 }
 0x38b   : > { %v593_v23 = vpop.permute.xlu0 %592 }
 0x38c   : > { %1023 = vst.msk [vmem:[#allocation3] sm:$0x1] %vm1021_vm5, %v593_v23  ;;  %v599_v24 = vsel %vm432_vm2, %v593_v23, %v597_v22 }
 0x38d   : > { %1257 = vmatmul.mubr.msk.f32.vlgmr.msra.gmra.mxu1 %vm434_vm3, %v599_v24 }
 0x38e   : > { %1301 = vmatpush3.msra.mxu1 %v746_v42  ;;  %1308 = vmatprep.mubr.msk.f32.mxu1 %vm1666_vm6, %v1663_v8 }
 0x38f   : > { %1302 = vmatprep.subr.mxu1 %v1663_v8 }
 0x390   : > { %1303 = vmatpush3.msra.mxu1 %v745_v43 }
 0x391   : > { %1304 = vmatprep.subr.mxu1 %v1663_v8 }
 0x392   : > { %1305 = vmatpush3.msra.mxu1 %v744_v44 }
 0x393   : > { %1306 = vmatprep.subr.mxu1 %v1663_v8 }
 0x394   : > { %1307 = vmatpush3.msra.mxu1 %v743_v45 }
 0x395   : > { %1346 = vmatprep.subr.mxu1 %v1663_v8 }
 0x44d   : > { %v698_v28 = vpop.f32.mrf.mxu1 }
 0x44e   : > { %v699_v29 = vadd.f32 %v698_v28, %v622_v26  ;;  %v934_v26 = vld [vmem:[%s2149_s3 + $0x38] sm:$0xff]  ;;  %v932_v28 = vld [vmem:[%s2149_s3 + $0x28] sm:$0xff] }
 0x44f   : > { %v700_v30 = vpop.f32.mrf.mxu1 }
 0x450   : > { %v701_v31 = vadd.f32 %v700_v30, %v626_v27  ;;  %704 = vrot.lane.b32.xlu0 %v699_v29, %s1662_s15  ;;  %v933_v27 = vld [vmem:[%s2149_s3 + $0x30] sm:$0xff]  ;;  %v930_v30 = vld [vmem:[%s2149_s3 + $0x18] sm:$0xff] }
 0x452   : > { %725 = vrot.lane.b32.xlu1 %v701_v31, %s1665_s30 }
 0x456   : > { %715 = vrot.lane.b32.xlu1 %v701_v31, %s1662_s15  ;;  %v929_v31 = vld [vmem:[%s2149_s3 + $0x10] sm:$0xff] }
 0x4c2   : > { %v705_v32 = vpop.permute.xlu0 %704 }
 0x4c3   : > { %v707_v33 = vadd.f32 %v705_v32, %v699_v29  ;;  %v928_v32 = vld [vmem:[%s2149_s3 + $0x8] sm:$0xff] }
 0x4c4   : > { %v726_v35 = vpop.permute.xlu1 %725 }
 0x4c5   : > { %v1258_v34 = vmul.f32 -1.442695, %v707_v33  ;;  %v927_v33 = vld [vmem:[%s2149_s3] sm:$0xff] }
 0x4c7   : > { %1448 = vpow2.f32 %v1258_v34 }
 0x4c8   : > { %v716_v47 = vpop.permute.xlu1 %715 }
 0x4c9   : > { %v718_v48 = vadd.f32 %v716_v47, %v699_v29 }
 0x4cb   : > { %v1259_v49 = vmul.f32 -1.442695, %v718_v48 }
 0x4d4   : > { %v1449_v37 = vpop.eup %1448 }
 0x4d5   : > { %v711_v38 = vadd.f32 1.0, %v1449_v37 }
 0x4d7   : > { %1450 = vrcp.f32 %v711_v38 }
 0x4e4   : > { %v1451_v36 = vpop.eup %1450 }
 0x4e5   : > { %v728_v39 = vmul.f32 %v1451_v36, %v726_v35 }
 0x4e7   : > { %730 = vrot.lane.b32.xlu0 %v728_v39, %s1664_s2 }
 0x559   : > { %v731_v40 = vpop.permute.xlu0 %730 }
 0x55a   : > { %v733_v41 = vadd.f32 %v731_v40, %v699_v29  ;;  %v931_v29 = vld [vmem:[%s2149_s3 + $0x20] sm:$0xff] }
 0x55c   : > { %1452 = vtanh.f32 %v733_v41 }
 0x55d   : > { %1454 = vpow2.f32 %v1259_v49 }
 0x569   : > { %v1453_v46 = vpop.eup %1452 }
 0x56a   : > { %737 = vrot.lane.b32.xlu0 %v1453_v46, %s1665_s30  ;;  %v1455_v50 = vpop.eup %1454 }
 0x56b   : > { %v722_v51 = vadd.f32 1.0, %v1455_v50 }
 0x56d   : > { %1456 = vrcp.f32 %v722_v51 }
 0x57a   : > { %v1457_v52 = vpop.eup %1456 }
 0x57b   : > { %v735_v53 = vsub.f32 1.0, %v1457_v52  ;;  %v741_v56 = vmul.f32 %v1457_v52, %v597_v22  ;;  %v835_v22 = vld [vmem:[%s2127_s5] sm:$0xff] }
 0x57c   : > { %1342 = vmatpush3.msra.mxu0 %v835_v22 }
 0x5dc   : > { %v738_v54 = vpop.permute.xlu0 %737 }
 0x5dd   : > { %v740_v55 = vmul.f32 %v738_v54, %v735_v53 }
 0x5df   : > { %v742_v57 = vadd.f32 %v741_v56, %v740_v55 }
 0x5e1   : > { %749 = vrot.lane.b32.xlu1 %v742_v57, %s1665_s30  ;;  %s1504_s30 = scalar_lea.vmem %s1071_s14, 16 }
 0x5e2   : > { %p1505_p0 = scmp.ne.s32.totalorder %s1071_s14, %s1504_s30 }
 0x5e4   : > { %p1506_p1 = pnand %p1505_p0, %p1774_p10 }
 0x5e6   : > { %p1507_p2 = pneg %p1506_p1 }
 0x653   : > { %v1893_v58 = vpop.permute.xlu1 %749 }
 0x654   : > { %1024 = vst.msk [vmem:[#allocation3 + $0x1] sm:$0x1] %vm1021_vm5, %v1893_v58  ;;  %1309 = vmatmul.mubr.msk.f32.vlgmr.msra.gmra.mxu1 %vm432_vm2, %v1893_v58 }
 0x655   : > { %1362 = vmatprep.mubr.msk.f32.mxu1 %vm1666_vm6, %v1663_v8  ;;  %1347 = vmatpush3.msra.mxu1 %v934_v26 }
 0x656   : > { %1348 = vmatprep.subr.mxu1 %v1663_v8 }
 0x657   : > { %1349 = vmatpush3.msra.mxu1 %v933_v27 }
 0x658   : > { %1350 = vmatprep.subr.mxu1 %v1663_v8 }
 0x659   : > { %1351 = vmatpush3.msra.mxu1 %v932_v28 }
 0x65a   : > { %1352 = vmatprep.subr.mxu1 %v1663_v8 }
 0x65b   : > { %v1028_v59 = vld [vmem:[#allocation3] sm:$0x3]  ;;  %1353 = vmatpush3.msra.mxu1 %v931_v29 }
 0x65c   : > { %1030 = vst.msk [vmem:[%s1816_s20] sm:$0x3] %vm1029_vm7, %v1028_v59  ;;  %1354 = vmatprep.subr.mxu1 %v1663_v8 }
 0x65d   : > { %1355 = vmatpush3.msra.mxu1 %v930_v30 }
 0x65e   : > { %1356 = vmatprep.subr.mxu1 %v1663_v8 }
 0x65f   : > { %1357 = vmatpush3.msra.mxu1 %v929_v31 }
 0x660   : > { %1358 = vmatprep.subr.mxu1 %v1663_v8 }
 0x661   : > { %1359 = vmatpush3.msra.mxu1 %v928_v32 }
 0x662   : > { %1360 = vmatprep.subr.mxu1 %v1663_v8  ;;  %v935_v8 = vld [vmem:[%s2149_s3 + $0x40] sm:$0x1] }
 0x663   : > { %1361 = vmatpush3.msra.mxu1 %v927_v33 }
 0x714   : > { %v819_v61 = vpop.f32.mrf.mxu1 }
 0x715   : > { %v820_v62 = vadd.f32 %v819_v61, %v747_v60 }
 0x716   : > { %v1310_v63 = vpop.f32.mrf.mxu1 }
 0x717   : > { %v824_v0 = vsel %vm823_vm8, %v820_v62, -inf }
 0x718   : > { %825 = vmax.xlane.f32.xlu0 %v824_v0 }
 0x7a1   : > { %v826_v10 = vpop.xlane.xlu0 %825 }
 0x7a2   : > { %v827_v11 = vsub.f32 %v820_v62, %v826_v10 }
 0x7a4   : > { %v828_v12 = vmul.f32 1.442695, %v827_v11 }
 0x7a6   : > { %1458 = vpow2.f32 %v828_v12 }
 0x7b3   : > { %v1459_v13 = vpop.eup %1458 }
 0x7b4   : > { %v830_v14 = vsel %vm823_vm8, %v1459_v13, 0.0 }
 0x7b5   : > { %831 = vadd.xlane.f32.xlu1 %v830_v14 }
 0x83e   : > { %v832_v23 = vpop.xlane.xlu1 %831 }
 0x83f   : > { %1460 = vrcp.f32 %v832_v23 }
 0x84c   : > { %v1461_v24 = vpop.eup %1460 }
 0x84d   : > { %v834_v25 = vmul.f32 %v1461_v24, %v1459_v13 }
 0x84f   : > { %1344 = vmatmul.mubr.f32.vlgmr.msra.gmra.mxu0 %v834_v25  ;;  %1026 = vst [vmem:[%s2136_s21] sm:$0x1] %v834_v25  ;;  %s1510_s21 = scalar_lea.vmem %s1509_s18, 32 }
 0x850   : > { %p1512_p4 = scmp.lt.s32.totalorder %s1510_s21, %s1504_s30 }
 0x852   : > { %p1513_p5 = por %p1512_p4, %p1511_p3 }
 0x854   : > { %p1514_p6 = pnand %p1513_p5, %p1507_p2 }
 0x90f   : > { %v917_v34 = vpop.f32.mrf.mxu0 }
 0x910   : > { %1022 = vst.msk [vmem:[#allocation2] sm:$0x1] %vm1021_vm5, %v917_v34  ;;  %1027 = vst.msk [vmem:[%s387_s19] sm:$0x1] %vm1021_vm5, %v917_v34  ;;  %923 = vrot.lane.b32.xlu0 %v917_v34, %s1662_s15  ;;  %s1035_s15 = sand.u32 1, %s1755_s25  }
 0x911   : > { %v1345_v37 = vpop.f32.mrf.mxu0  ;;  %s2029_s16 = scalar_lea.sflag [#allocation11], %s1035_s15 }
 0x982   : > { %v924_v38 = vpop.permute.xlu0 %923 }
 0x983   : > { %v926_v36 = vsel %vm432_vm2, %v1893_v58, %v924_v38 }
 0x984   : > { %1363 = vmatmul.mubr.msk.f32.vlgmr.msra.gmra.mxu1 %vm434_vm3, %v926_v36 }
 0xa44   : > { %v1005_v35 = vpop.f32.mrf.mxu1 }
 0xa45   : > { %v1006_v39 = vadd.f32 %v1005_v35, %v935_v8 }
 0xa46   : > { %v1364_v40 = vpop.f32.mrf.mxu1 }
 0xa47   : > { %v1009_v41 = vsel %vm823_vm8, %v1006_v39, -inf }
 0xa48   : > { %1010 = vmax.xlane.f32.xlu1 %v1009_v41 }
 0xad1   : > { %v1011_v42 = vpop.xlane.xlu1 %1010 }
 0xad2   : > { %v2015_v43 = vsub.f32 %v1006_v39, %v1011_v42 }
 0xad4   : > { %v1013_v44 = vmul.f32 1.442695, %v2015_v43 }
 0xad6   : > { %1462 = vpow2.f32 %v1013_v44 }
 0xae3   : > { %v1463_v45 = vpop.eup %1462 }
 0xae4   : > { %v1015_v46 = vsel %vm823_vm8, %v1463_v45, 0.0 }
 0xae5   : > { %1016 = vadd.xlane.f32.xlu1 %v1015_v46 }
 0xae6   : > { %1517 = shalt.err (!%p1514_p6)
}
 0xae7   : > { %s1518_s2 = scalar_lea.hbm %s1068_s29, 16  ;;  %s1522_s26 = scalar_lea.hbm %s2131_s9, 48 }
 0xae8   : > { %p1519_p7 = scmp.ne.s32.totalorder %s1068_s29, %s1518_s2  ;;  %p1523_p12 = scmp.lt.s32.totalorder %s1068_s29, %s2131_s9 }
 0xae9   : > { %p1524_p11 = scmp.lt.s32.totalorder %s1522_s26, %s1518_s2 }
 0xaea   : > { %p1520_p8 = pnand %p1519_p7, %p1774_p10 }
 0xaeb   : > { %p1525_p13 = por %p1524_p11, %p1523_p12 }
 0xaec   : > { %p1521_p9 = pneg %p1520_p8 }
 0xaee   : > { %p1526_p0 = pnand %p1525_p13, %p1521_p9 }
 0xaf0   : > { %1529 = shalt.err (!%p1526_p0)
}
 0xaf1   : > { %1370 = dma.vmem_to_hbm [thread:$0]  (%p1774_p10), %s1071_s14, 16, %s1068_s29, %s2029_s16  }
 0xaf2   : > { %s1265_s18 = sshll.u32 %s1755_s25, 5  ;;  %s1083_s19 = sshll.u32 %s1816_s20, 4  ;;  %s1084_s19 = int_to_ptr.vmem [resolvable:$true] %s1083_s19 }
 0xaf3   : > { %s1081_s17 = scalar_lea.hbm %s2132_s10, %s1265_s18  ;;  %s1530_s1 = scalar_lea.vmem %s1084_s19, 32 }
 0xaf4   : > { %p1531_p1 = scmp.ne.s32.totalorder %s1084_s19, %s1530_s1  ;;  %s1668_s3 = smov [#allocation12]  }
 0xaf5   : > { %s1534_s2 = sshll.u32 %s1668_s3, 4  ;;  %s1535_s2 = int_to_ptr.vmem [resolvable:$false] %s1534_s2 }
 0xaf6   : > { %p1532_p2 = pnand %p1531_p1, %p1774_p10  ;;  %s1536_s15 = scalar_lea.vmem %s1535_s2, 64 }
 0xaf7   : > { %p1537_p4 = scmp.lt.s32.totalorder %s1084_s19, %s1535_s2  ;;  %p1538_p5 = scmp.lt.s32.totalorder %s1536_s15, %s1530_s1 }
 0xaf8   : > { %p1533_p3 = pneg %p1532_p2 }
 0xaf9   : > { %p1539_p6 = por %p1538_p5, %p1537_p4 }
 0xafb   : > { %p1540_p7 = pnand %p1539_p6, %p1533_p3 }
 0xafd   : > { %1543 = shalt.err (!%p1540_p7)
}
 0xafe   : > { %s1544_s25 = scalar_lea.hbm %s1081_s17, 32  ;;  %s1548_s14 = scalar_lea.hbm %s2132_s10, 96 }
 0xaff   : > { %p1545_p8 = scmp.ne.s32.totalorder %s1081_s17, %s1544_s25  ;;  %p1549_p11 = scmp.lt.s32.totalorder %s1081_s17, %s2132_s10 }
 0xb00   : > { %p1550_p13 = scmp.lt.s32.totalorder %s1548_s14, %s1544_s25 }
 0xb01   : > { %p1546_p9 = pnand %p1545_p8, %p1774_p10 }
 0xb02   : > { %p1551_p0 = por %p1550_p13, %p1549_p11 }
 0xb03   : > { %p1547_p12 = pneg %p1546_p9 }
 0xb05   : > { %p1552_p1 = pnand %p1551_p0, %p1547_p12 }
 0xb07   : > { %1555 = shalt.err (!%p1552_p1)
}
 0xb08   : > { %1371 = dma.vmem_to_hbm [thread:$0]  (%p1774_p10), %s1084_s19, 32, %s1081_s17, %s2029_s16  }
 0xb09   : > { %s1094_s1 = scalar_lea.hbm %s2133_s11, %s2021_s23  ;;  %s2150_s3 = scalar_lea.vmem [#allocation13], %s1804_s28 }
 0xb0a   : > { %s1096_s2 = sshll.u32 %s2150_s3, 4  ;;  %s1045_s15 = scalar_lea.sflag [#allocation14], %s1804_s28  ;;  %s1097_s2 = int_to_ptr.vmem [resolvable:$true] %s1096_s2 }
 0xb0b   : > { %s1556_s25 = scalar_lea.vmem %s1097_s2, 16  ;;  %s1669_s20 = smov [#allocation13]  }
 0xb0c   : > { %p1557_p2 = scmp.ne.s32.totalorder %s1097_s2, %s1556_s25  ;;  %s1560_s29 = sshll.u32 %s1669_s20, 4  ;;  %s1561_s29 = int_to_ptr.vmem [resolvable:$false] %s1560_s29 }
 0xb0d   : > { %s1562_s14 = scalar_lea.vmem %s1561_s29, 32  ;;  %p1563_p5 = scmp.lt.s32.totalorder %s1097_s2, %s1561_s29 }
 0xb0e   : > { %p1558_p3 = pnand %p1557_p2, %p1774_p10  ;;  %p1564_p6 = scmp.lt.s32.totalorder %s1562_s14, %s1556_s25 }
 0xb10   : > { %p1559_p4 = pneg %p1558_p3  ;;  %p1565_p7 = por %p1564_p6, %p1563_p5 }
 0xb12   : > { %p1566_p8 = pnand %p1565_p7, %p1559_p4 }
 0xb14   : > { %1569 = shalt.err (!%p1566_p8)
}
 0xb15   : > { %s1570_s16 = scalar_lea.hbm %s1094_s1, 16  ;;  %s1574_s26 = scalar_lea.hbm %s2133_s11, 48 }
 0xb16   : > { %p1571_p9 = scmp.ne.s32.totalorder %s1094_s1, %s1570_s16  ;;  %p1575_p13 = scmp.lt.s32.totalorder %s1094_s1, %s2133_s11 }
 0xb17   : > { %p1576_p0 = scmp.lt.s32.totalorder %s1574_s26, %s1570_s16 }
 0xb18   : > { %p1572_p12 = pnand %p1571_p9, %p1774_p10 }
 0xb19   : > { %p1577_p1 = por %p1576_p0, %p1575_p13 }
 0xb1a   : > { %p1573_p11 = pneg %p1572_p12 }
 0xb1c   : > { %p1578_p2 = pnand %p1577_p1, %p1573_p11 }
 0xb1e   : > { %1581 = shalt.err (!%p1578_p2)
}
 0xb1f   : > { %1372 = dma.vmem_to_hbm [thread:$0]  (%p1774_p10), %s1097_s2, 16, %s1094_s1, %s1045_s15  }
 0xb20   : > { %s2151_s30 = scalar_lea.vmem [#allocation9], %s1804_s28  ;;  %s1055_s29 = scalar_lea.hbm %s2130_s8, %s2021_s23 }
 0xb21   : > { %s1057_s3 = sshll.u32 %s2151_s30, 4  ;;  %s2152_s14 = smov %s2151_s30  ;;  %s1058_s3 = int_to_ptr.vmem [resolvable:$true] %s1057_s3 }
 0xb22   : > { %s1032_s16 = scalar_lea.sflag [#allocation8], %s1804_s28  ;;  %s1582_s17 = scalar_lea.vmem %s1058_s3, 16 }
 0xb23   : > { %p1583_p3 = scmp.ne.s32.totalorder %s1058_s3, %s1582_s17  ;;  %s1670_s1 = smov [#allocation9]  }
 0xb24   : > { %s1586_s2 = sshll.u32 %s1670_s1, 4  ;;  %s1587_s2 = int_to_ptr.vmem [resolvable:$false] %s1586_s2 }
 0xb25   : > { %p1584_p4 = pnand %p1583_p3, %p1774_p10  ;;  %s1588_s15 = scalar_lea.vmem %s1587_s2, 32 }
 0xb26   : > { %p1589_p6 = scmp.lt.s32.totalorder %s1058_s3, %s1587_s2  ;;  %p1590_p7 = scmp.lt.s32.totalorder %s1588_s15, %s1582_s17 }
 0xb27   : > { %p1585_p5 = pneg %p1584_p4 }
 0xb28   : > { %p1591_p8 = por %p1590_p7, %p1589_p6 }
 0xb2a   : > { %p1592_p9 = pnand %p1591_p8, %p1585_p5 }
 0xb6e   : > { %v1017_v47 = vpop.xlane.xlu1 %1016 }
 0xb6f   : > { %1464 = vlog2.f32 %v1017_v47 }
 0xb7c   : > { %v1465_v48 = vpop.eup %1464 }
 0xb7d   : > { %v1019_v49 = vmul.f32 0.6931472, %v1465_v48 }
 0xb7f   : > { %v1020_v50 = vsub.f32 %v2015_v43, %v1019_v49 }
 0xb81   : > { %1025 = vst [vmem:[%s2152_s14] sm:$0x1] %v1020_v50 }
 0xb82   : > { %1595 = shalt.err (!%p1592_p9)
}
 0xb83   : > { %s1596_s19 = scalar_lea.hbm %s1055_s29, 16  ;;  %s1600_s26 = scalar_lea.hbm %s2130_s8, 48 }
 0xb84   : > { %p1597_p12 = scmp.ne.s32.totalorder %s1055_s29, %s1596_s19  ;;  %p1601_p0 = scmp.lt.s32.totalorder %s1055_s29, %s2130_s8 }
 0xb85   : > { %p1602_p1 = scmp.lt.s32.totalorder %s1600_s26, %s1596_s19 }
 0xb86   : > { %p1598_p11 = pnand %p1597_p12, %p1774_p10 }
 0xb87   : > { %p1603_p2 = por %p1602_p1, %p1601_p0 }
 0xb88   : > { %p1599_p13 = pneg %p1598_p11 }
 0xb8a   : > { %p1604_p3 = pnand %p1603_p2, %p1599_p13 }
 0xb8c   : > { %1607 = shalt.err (!%p1604_p3)
}
 0xb8d   : > { %1369 = dma.vmem_to_hbm [thread:$0]  (%p1774_p10), %s1058_s3, 16, %s1055_s29, %s1032_s16  }
 0xb8e PF: > { %p1396_p4 = scmp.ge.s32.totalorder %s1656_s24, 2  ;;  %s1108_s30 = sand.u32 1, %s1644_s0  }
 0xb8f   : > { %p2153_p5 = scmp.ne.s32.totalorder %s2143_s13, 0  ;;  %s1109_s25 = scalar_lea.sflag [#allocation8], %s1108_s30 }
 0xb91   : > { %p1382_p6 = pnand %p1396_p4, %p2153_p5 }
 0xb93   : > { %p1383_p7 = pneg %p1382_p6 }
 0xb95   : > { %1631 = dma.done.wait (%p1383_p7), %s1109_s25, 16  }
 0xb96   : > { %1633 = vsyncadd (%p1383_p7), %s1109_s25, 4294967280  ;;  %s2154_s20 = sadd.s32 4294967294, %s1656_s24  }
 0xb97   : > { %s1116_s14 = sand.u32 1, %s2154_s20  }
 0xb98   : > { %s1117_s17 = scalar_lea.sflag [#allocation11], %s1116_s14 }
 0xb99   : > { %1635 = dma.done.wait (%p1383_p7), %s1117_s17, 48  }
 0xb9a   : > { %1637 = vsyncadd (%p1383_p7), %s1117_s17, 4294967248  ;;  %s1134_s12 = scalar_lea.sflag [#allocation14], %s1108_s30 }
 0xb9b   : > { %1639 = dma.done.wait (%p1383_p7), %s1134_s12, 16  }
 0xb9c   : > { %1641 = vsyncadd (%p1383_p7), %s1134_s12, 4294967280  ;;  %s2155_s3 = sld [smem:[#allocation20_spill]]  ;;  %p35_p10 = scmp.ge.s32.totalorder %s1759_s27, 5  }
 0xb9d   : > { %s2156_s23 = sld [smem:[#allocation21_spill]]  ;;  %s2157_s0 = smov %s1648_s22 }
 0xb9e   : > { %s2159_s24 = smov %s1759_s27  ;;  %37 = sbr.rel (!%p35_p10) target bundleno = 24 (0x18), region = 143 }
 0xba2   : > { %s2158_s22 = smov %s2155_s3 }
 0xba3   :  { %1138 = vsyncpa [#allocation7], 1 }
 0xba4   :  { %1140 = vsyncpa [#allocation7 + $0x1], 1 }
 0xba5   :  { %1141 = vsyncpa [#allocation8], 1 }
 0xba6   :  { %1143 = vsyncpa [#allocation8 + $0x1], 1 }
 0xba7   :  { %1144 = vsyncpa [#allocation11], 1 }
 0xba8   :  { %1146 = vsyncpa [#allocation11 + $0x1], 1 }
 0xba9   :  { %1147 = vsyncpa [#allocation14], 1 }
 0xbaa   :  { %1149 = vsyncpa [#allocation14 + $0x1], 1 }

</bundles_post_ra>
